<compile_context>
chip_gen: v7x
topology: tpu7x:2x2x1
jax: 0.10.0
libtpu: 0.0.40
codegen_flags: <defaults>
</compile_context>

<pallas_src>
import jax
import jax.numpy as jnp
from jax.experimental import pallas as pl
from jax.experimental.pallas import tpu as pltpu


def _gated_activation_kernel(x_ref, o_ref):
    # x_ref block: (1, 2, TR, L)  -- [.., 0, :, :] = first half (a),
    #                                 [.., 1, :, :] = second half (b).
    # o_ref block: (1, TR, L)
    a = x_ref[0, 0, :, :].astype(jnp.float32)
    b = x_ref[0, 1, :, :].astype(jnp.float32)
    # sigmoid(b) == 0.5 * (1 + tanh(0.5 * b)): 2 EUP pushes per element instead
    # of 3 (tanh + exp + reciprocal); mul/add go to the VPU (has slack).
    sig_b = 0.5 * (jnp.tanh(0.5 * b) + 1.0)
    o_ref[0, :, :] = (jnp.tanh(a) * sig_b).astype(o_ref.dtype)


def _row_tile(rows, lanes, itemsize, pack, n):
    """Pick a per-half row tile: ~2 MiB, sublane-packed, no divisor search."""
    max_tile_bytes = 2 << 20  # per channel-half; live VMEM ~= 6x this (fits 16 MiB)
    max_rows = max(pack, (max_tile_bytes // (lanes * itemsize)) // pack * pack)
    if rows <= max_rows:
        tr = rows           # full extent: always a legal block shape
    else:
        tr = max_rows       # ragged last block is masked by Pallas

    # v7x megacore: keep >= ~8 grid steps so both TensorCores get work when N
    # is small.  Best effort; never go below one packed vreg of rows.
    min_steps = 8
    if n * (-(-rows // tr)) < min_steps and rows > pack:
        want = -(-min_steps // n)                    # ceil(min_steps / n) tiles per batch
        tr_small = -(-rows // want)                  # ceil(rows / want)
        tr_small = -(-tr_small // pack) * pack       # round up to sublane pack
        tr = max(pack, min(tr, tr_small))
    return tr


def gated_activation(x):
    """x: (N, 2C, H, W) -> (N, C, H, W), tanh(x[:, :C]) * sigmoid(x[:, C:])."""
    n, c2, h, w = x.shape
    assert c2 % 2 == 0, "channel dim must be even for chunk(2, dim=1)"
    c = c2 // 2
    e = c * h * w                                   # elements per half per batch element

    itemsize = jnp.dtype(x.dtype).itemsize
    pack = max(8, 32 // itemsize)                   # sublane rows per packed vreg
    lanes = 128

    # Lane-dense layout: each half -> (rows, 128).  Pad only if e % 128 != 0
    # (fallback path); padding restores packed vregs and bounded tiles.
    if e % lanes == 0:
        e_pad = e
    else:
        align = pack * lanes
        e_pad = -(-e // align) * align
    rows = e_pad // lanes

    if e_pad == e:
        # Free contiguous reshape; axis 1 index 0/1 selects channel half a/b.
        x_slab = x.reshape(n, 2, rows, lanes)
    else:
        x_flat = x.reshape(n, 2, e)
        x_slab = jnp.pad(
            x_flat, ((0, 0), (0, 0), (0, e_pad - e))
        ).reshape(n, 2, rows, lanes)

    tr = _row_tile(rows, lanes, itemsize, pack, n)
    grid = (n, pl.cdiv(rows, tr))

    out_slab = pl.pallas_call(
        _gated_activation_kernel,
        out_shape=jax.ShapeDtypeStruct((n, rows, lanes), x.dtype),
        grid=grid,
        in_specs=[
            # Both halves in one block -> one DMA per step instead of two.
            pl.BlockSpec((1, 2, tr, lanes), lambda i, r: (i, 0, r, 0)),
        ],
        out_specs=pl.BlockSpec((1, tr, lanes), lambda i, r: (i, r, 0)),
        compiler_params=pltpu.CompilerParams(
            dimension_semantics=("parallel", "parallel"),
            # Explicit limit: keeps full double-buffering with 2 MiB half-tiles
            # even on v5e's 16 MiB scoped-VMEM default; safe on v6e/v7x.
            vmem_limit_bytes=32 << 20,
        ),
    )(x_slab)

    if e_pad == e:
        return out_slab.reshape(n, c, h, w)
    return out_slab.reshape(n, rows * lanes)[:, :e].reshape(n, c, h, w)


if __name__ == "__main__":
    key = jax.random.PRNGKey(0)
    # N=2, 2C=4 (so C=2), H=W=16 — even channel count so chunk(2, dim=1) works.
    x = jax.random.normal(key, (2, 4, 16, 16), dtype=jnp.float32)

    out = gated_activation(x)
    out = jax.block_until_ready(out)

    # Reference check in plain JAX (same math as the PyTorch forward).
    a, b = jnp.split(x, 2, axis=1)
    ref = jnp.tanh(a) * jax.nn.sigmoid(b)
    assert out.shape == ref.shape == (2, 2, 16, 16)
    assert jnp.allclose(out, ref, atol=1e-5, rtol=1e-5)

    print("KERNEL_OK")
</pallas_src>

<mosaic_0001>
module attributes {stable_mosaic.version = 11 : i64} {
  func.func @_gated_activation_kernel(%arg0: i32, %arg1: i32, %arg2: memref<1x2x4x128xf32, #tpu.memory_space<vmem>>, %arg3: memref<1x4x128xf32, #tpu.memory_space<vmem>>) attributes {dimension_semantics = [#tpu.dimension_semantics<parallel>, #tpu.dimension_semantics<parallel>], iteration_bounds = array<i64: 2, 1>, scalar_prefetch = 0 : i64, scratch_operands = 0 : i64, tpu.core_type = #tpu.core_type<tc>, window_params = [{transform_indices = @transform_0, window_bounds = array<i64: 1, 2, 4, 128>}, {transform_indices = @transform_1, window_bounds = array<i64: 1, 4, 128>}]} {
    %c0 = arith.constant 0 : index
    %c0_0 = arith.constant 0 : index
    %c0_1 = arith.constant 0 : index
    %c0_2 = arith.constant 0 : index
    %0 = vector.load %arg2[%c0, %c0_0, %c0_1, %c0_2] : memref<1x2x4x128xf32, #tpu.memory_space<vmem>>, vector<1x1x4x128xf32>
    %1 = vector.shape_cast %0 : vector<1x1x4x128xf32> to vector<4x128xf32>
    %c0_3 = arith.constant 0 : index
    %c1 = arith.constant 1 : index
    %c0_4 = arith.constant 0 : index
    %c0_5 = arith.constant 0 : index
    %2 = vector.load %arg2[%c0_3, %c1, %c0_4, %c0_5] : memref<1x2x4x128xf32, #tpu.memory_space<vmem>>, vector<1x1x4x128xf32>
    %3 = vector.shape_cast %2 : vector<1x1x4x128xf32> to vector<4x128xf32>
    %cst = arith.constant 5.000000e-01 : f32
    %4 = vector.broadcast %cst : f32 to vector<4x128xf32>
    %5 = arith.mulf %4, %3 : vector<4x128xf32>
    %6 = math.tanh %5 : vector<4x128xf32>
    %cst_6 = arith.constant 1.000000e+00 : f32
    %7 = vector.broadcast %cst_6 : f32 to vector<4x128xf32>
    %8 = arith.addf %6, %7 : vector<4x128xf32>
    %cst_7 = arith.constant 5.000000e-01 : f32
    %9 = vector.broadcast %cst_7 : f32 to vector<4x128xf32>
    %10 = arith.mulf %9, %8 : vector<4x128xf32>
    %11 = math.tanh %1 : vector<4x128xf32>
    %12 = arith.mulf %11, %10 : vector<4x128xf32>
    %c0_8 = arith.constant 0 : index
    %c0_9 = arith.constant 0 : index
    %c0_10 = arith.constant 0 : index
    %13 = vector.load %arg3[%c0_8, %c0_9, %c0_10] : memref<1x4x128xf32, #tpu.memory_space<vmem>>, vector<1x4x128xf32>
    %14 = vector.shape_cast %13 : vector<1x4x128xf32> to vector<4x128xf32>
    %15 = vector.shape_cast %12 : vector<4x128xf32> to vector<1x4x128xf32>
    tpu.vector_store %arg3[%c0_8, %c0_9, %c0_10], %15 {strides = array<i32>} : memref<1x4x128xf32, #tpu.memory_space<vmem>>, vector<1x4x128xf32>,
    return
  }
  func.func @transform_0(%arg0: i32, %arg1: i32) -> (i32, i32, i32, i32) {
    %c0_i32 = arith.constant 0 : i32
    %c0_i32_0 = arith.constant 0 : i32
    %c0_i32_1 = arith.constant 0 : i32
    return %arg0, %c0_i32, %arg1, %c0_i32_0 : i32, i32, i32, i32
  }
  func.func @transform_1(%arg0: i32, %arg1: i32) -> (i32, i32, i32) {
    %c0_i32 = arith.constant 0 : i32
    %c0_i32_0 = arith.constant 0 : i32
    return %arg0, %arg1, %c0_i32 : i32, i32, i32
  }
}

</mosaic_0001>

<bundles_post_ra>
// kernel: tpu_custom_call.1
= control target key start
LH: loop header
LB: loop body
LE: loop exit
PB: predicated region body
PF: predicated region fallthrough
CT: control target
= control target key end

     0   :  { %6 = vsyncpa [#allocation3], 0  ;;  %s644_s0 = inlined_call_operand.hbm [shape: f32[2,2,4,128], index: 0, kind: input, shape index: {}]   ;;  %s645_s1 = inlined_call_operand.hbm [shape: f32[2,4,128], index: 1, kind: output, shape index: {}]  }
   0x1   :  { %8 = vsyncpa [#allocation3 + $0x1], 0 }
   0x2   :  { %9 = vsyncpa [#allocation4], 0 }
   0x3   :  { %11 = vsyncpa [#allocation4 + $0x1], 0  ;;  %s470_s6 = smov 0   ;;  %s472_s7 = smov 0  }
   0x4   :  { %s474_s8 = smov 0   ;;  %s476_s9 = smov 0  }
   0x5   :  { %s478_s10 = smov 0   ;;  %s480_s11 = smov 0  }
   0x6 LB: > { %s258_s12 = sadd.s32 4294967295, %s454_s11   ;;  %s259_s13 = sadd.s32 4294967294, %s454_s11   ;;  %s454_s11 = sphi %s480_s11, %s17_s11   ;;  %s450_s10 = sphi %s478_s10, %s660_s10   ;;  %s446_s9 = sphi %s476_s9, %s659_s9   ;;  %s442_s8 = sphi %s474_s8, %s658_s8   ;;  %s438_s7 = sphi %s472_s7, %s657_s7   ;;  %s434_s6 = sphi %s470_s6, %s656_s6  }
   0x7   : > { %s29_s14 = sadd.s32 1, %s450_s10  ;;  %s38_s15 = sadd.s32 1, %s442_s8 }
   0x8   : > { %p31_p0 = scmp.ge.s32.totalorder %s29_s14, 2  ;;  %p45_p1 = scmp.ne.s32.totalorder %s442_s8, %s438_s7 }
   0x9   : > { %p46_p2 = scmp.eq.s32.totalorder %s454_s11, 0  ;;  %p51_p3 = scmp.ne.s32.totalorder %s438_s7, %s434_s6 }
   0xa   : > { %s662_s14 = smov (%p31_p0, %s29_s14), 0  ;;  %p52_p5 = scmp.eq.s32.totalorder %s258_s12, 0 }
   0xb   : > { %p511_p4 = por %p46_p2, %p45_p1  ;;  %s33_s17 = ssub.s32 %s450_s10, %s662_s14 }
   0xc   : > { %p77_p6 = scmp.eq.s32.totalorder %s258_s12, 1  ;;  %p36_p7 = scmp.eq.s32.totalorder %s33_s17, 0 }
   0xd   : > { %p517_p8 = por %p52_p5, %p51_p3  ;;  %p83_p10 = scmp.eq.s32.totalorder %s259_s13, 1 }
   0xe   : > { %p521_p9 = por %p77_p6, %p45_p1  ;;  %p286_p13 = scmp.lt.s32.totalorder %s454_s11, 2 }
   0xf   : > { %s526_s20 = scalar_select %p36_p7, %s442_s8, %s38_s15  }
  0x10   : > { %s649_s19 = scalar_select %p521_p9, 1, 0 }
  0x11   : > { %p528_p11 = por %p83_p10, %p51_p3  ;;  %s103_s22 = sand.u32 1, %s442_s8  }
  0x12   : > { %s262_s23 = sshll.u32 %s103_s22, 3  ;;  %s273_s24 = sshll.u32 %s450_s10, 7 }
  0x13   : > { %s650_s21 = scalar_select %p528_p11, 1, 0 }
  0x14   : > { %s539_s27 = scalar_lea.hbm %s644_s0, %s273_s24  ;;  %s107_s28 = scalar_lea.vmem [#allocation2], %s262_s23 }
  0x15   : > { %s115_s29 = sshll.u32 %s107_s28, 4  ;;  %p545_p0 = pnand %p286_p13, %p511_p4  ;;  %s541_s29 = int_to_ptr.vmem [resolvable:$true] %s115_s29 }
  0x16   : > { %s550_s2 = scalar_lea.sflag [#allocation3], %s103_s22  ;;  %s342_s3 = scalar_lea.hbm %s539_s27, 128 }
  0x17   : > { %p343_p2 = scmp.ne.s32.totalorder %s539_s27, %s342_s3  ;;  %p344_p3 = pneg %p545_p0 }
  0x18   : > { %s347_s12 = scalar_lea.hbm %s644_s0, 256  ;;  %p348_p4 = scmp.lt.u32.totalorder %s539_s27, %s644_s0 }
  0x19   : > { %p345_p5 = pnand %p344_p3, %p343_p2  ;;  %p349_p7 = scmp.lt.u32.totalorder %s347_s12, %s342_s3 }
  0x1a   : > { %p351_p13 = scmp.lt.u32.totalorder %s342_s3, %s539_s27 }
  0x1b   : > { %p346_p6 = pneg %p345_p5  ;;  %p350_p10 = por %p349_p7, %p348_p4 }
  0x1d   : > { %p352_p12 = por %p351_p13, %p350_p10 }
  0x1f   : > { %p353_p1 = pnand %p352_p12, %p346_p6 }
  0x21   : > { %356 = shalt.err (!%p353_p1)
}
  0x22   : > { %s357_s16 = scalar_lea.vmem %s541_s29, 128  ;;  %s456_s17 = smov [#allocation2]  }
  0x23   : > { %p358_p2 = scmp.ne.s32.totalorder %s541_s29, %s357_s16  ;;  %s362_s22 = sshll.u32 %s456_s17, 4  ;;  %s363_s22 = int_to_ptr.vmem [resolvable:$false] %s362_s22 }
  0x24   : > { %s364_s23 = scalar_lea.vmem %s363_s22, 256  ;;  %p365_p9 = scmp.lt.s32.totalorder %s541_s29, %s363_s22 }
  0x25   : > { %p360_p5 = pnand %p358_p2, %p344_p3  ;;  %p366_p4 = scmp.lt.s32.totalorder %s364_s23, %s357_s16 }
  0x27   : > { %p361_p11 = pneg %p360_p5  ;;  %p367_p7 = por %p366_p4, %p365_p9 }
  0x29   : > { %p368_p10 = pnand %p367_p7, %p361_p11 }
  0x2b   : > { %371 = shalt.err (!%p368_p10)
}
  0x2c   : > { %s457_s24 = smov 64   ;;  %s458_s25 = smov 4  }
  0x2d   : > { %281 = dma.hbm_to_vmem [thread:$0]  (!%p545_p0), %s539_s27, 128, %s541_s29, %s550_s2, %s457_s24, %s457_s24, %s458_s25  }
  0x2e   : > { %p123_p12 = scmp.lt.s32.totalorder %s454_s11, 3  ;;  %p652_p1 = scmp.ge.s32.totalorder %s454_s11, 1 }
  0x30   : > { %p124_p3 = pnand %p652_p1, %p123_p12 }
  0x31   : > { %s582_s26 = sand.u32 (!%p124_p3), 1, %s438_s7  }
  0x32   : > { %127 = sbr.rel (%p124_p3) target bundleno = 92 (0x5c), region = 24  ;;  %s266_s28 = sshll.u32 (!%p124_p3), %s582_s26, 3 }
  0x33   : > { %s130_s3 = scalar_lea.sflag (!%p124_p3), [#allocation3], %s582_s26  ;;  %s133_s4 = scalar_lea.vmem (!%p124_p3), [#allocation2], %s266_s28 }
  0x39   : > { %425 = dma.done.wait (%p517_p8), %s130_s3, 128  }
  0x3a   : > { %427 = vsyncadd (%p517_p8), %s130_s3, 4294967168  ;;  %v268_v0 = vld [vmem:[%s133_s4 + $0x4] sm:$0xf]  ;;  %v152_v2 = vld [vmem:[%s133_s4] sm:$0xf]  ;;  %s267_s27 = sshll.u32 %s582_s26, 2 }
  0x3b   : > { %v155_v1 = vmul.f32 0.5, %v268_v0  ;;  %s151_s29 = scalar_lea.vmem [#allocation5], %s267_s27  ;;  %s270_s2 = sshll.u32 %s446_s9, 6 }
  0x3c   : > { %s177_s30 = sshll.u32 %s151_s29, 4  ;;  %s597_s12 = scalar_lea.hbm %s645_s1, %s270_s2  ;;  %s592_s30 = int_to_ptr.vmem [resolvable:$true] %s177_s30 }
  0x3d   : > { %338 = vtanh.f32 %v155_v1  ;;  %s163_s13 = scalar_lea.sflag [#allocation4], %s582_s26  ;;  %s372_s15 = scalar_lea.vmem %s592_s30, 64 }
  0x3e   : > { %340 = vtanh.f32 %v152_v2  ;;  %p373_p8 = scmp.ne.s32.totalorder %s592_s30, %s372_s15  ;;  %p653_p9 = scmp.ne.s32.totalorder %s649_s19, 0 }
  0x3f   : > { %s459_s9 = smov [#allocation5]  }
  0x40   : > { %p374_p11 = pnand %p373_p8, %p653_p9  ;;  %s376_s16 = sshll.u32 %s459_s9, 4  ;;  %s377_s16 = int_to_ptr.vmem [resolvable:$false] %s376_s16 }
  0x41   : > { %s378_s17 = scalar_lea.vmem %s377_s16, 128  ;;  %p379_p6 = scmp.lt.s32.totalorder %s592_s30, %s377_s16 }
  0x42   : > { %p375_p0 = pneg %p374_p11  ;;  %p380_p13 = scmp.lt.s32.totalorder %s378_s17, %s372_s15 }
  0x44   : > { %p381_p2 = por %p380_p13, %p379_p6 }
  0x46   : > { %p382_p5 = pnand %p381_p2, %p375_p0 }
  0x47   : > { %v339_v3 = vpop.eup %338 }
  0x48   : > { %v157_v4 = vadd.f32 1.0, %v339_v3  ;;  %v341_v5 = vpop.eup %340 }
  0x4a   : > { %v158_v6 = vmul.f32 0.5, %v157_v4 }
  0x4c   : > { %v160_v7 = vmul.f32 %v341_v5, %v158_v6 }
  0x4e   : > { %161 = vst [vmem:[%s151_s29] sm:$0xf] %v160_v7 }
  0x4f   : > { %385 = shalt.err (!%p382_p5)
}
  0x50   : > { %s386_s22 = scalar_lea.hbm %s597_s12, 64  ;;  %s390_s25 = scalar_lea.hbm %s645_s1, 128 }
  0x51   : > { %p387_p4 = scmp.ne.s32.totalorder %s597_s12, %s386_s22  ;;  %p391_p12 = scmp.lt.u32.totalorder %s597_s12, %s645_s1 }
  0x52   : > { %p392_p1 = scmp.lt.u32.totalorder %s390_s25, %s386_s22  ;;  %p394_p8 = scmp.lt.u32.totalorder %s386_s22, %s597_s12 }
  0x53   : > { %p388_p7 = pnand %p387_p4, %p653_p9 }
  0x54   : > { %p393_p3 = por %p392_p1, %p391_p12 }
  0x55   : > { %p389_p10 = pneg %p388_p7 }
  0x56   : > { %p395_p11 = por %p394_p8, %p393_p3 }
  0x58   : > { %p396_p0 = pnand %p395_p11, %p389_p10 }
  0x5a   : > { %399 = shalt.err (!%p396_p0)
}
  0x5b   : > { %276 = dma.vmem_to_hbm [thread:$0]  (%p653_p9), %s592_s30, 64, %s597_s12, %s163_s13  }
  0x5c PF: > { %s189_s3 = sand.u32 1, %s434_s6   ;;  %p654_p6 = scmp.ne.s32.totalorder %s650_s21, 0 }
  0x5d   : > { %p655_p13 = scmp.ge.s32.totalorder %s454_s11, 2  ;;  %s190_s4 = scalar_lea.sflag [#allocation4], %s189_s3 }
  0x5f   : > { %p283_p2 = pnand %p655_p13, %p654_p6 }
  0x61   : > { %429 = dma.done.wait (!%p283_p2), %s190_s4, 64  }
  0x62   : > { %431 = vsyncadd (!%p283_p2), %s190_s4, 4294967232  ;;  %s17_s11 = sadd.s32 1, %s454_s11   ;;  %s656_s6 = smov %s438_s7 }
  0x63   : > { %p14_p5 = scmp.ge.s32.totalorder %s17_s11, 4   ;;  %s657_s7 = smov %s442_s8 }
  0x64   : > { %s658_s8 = smov %s526_s20  ;;  %s659_s9 = smov %s450_s10 }
  0x65   : > { %s660_s10 = smov %s662_s14  ;;  %16 = sbr.rel (!%p14_p5) target bundleno = 6 (0x6), region = 70 }
  0x6c   :  { %195 = vsyncpa [#allocation3], 1 }
  0x6d   :  { %197 = vsyncpa [#allocation3 + $0x1], 1 }
  0x6e   :  { %198 = vsyncpa [#allocation4], 1 }
  0x6f   :  { %200 = vsyncpa [#allocation4 + $0x1], 1 }

</bundles_post_ra>
